<compile_context>
chip_gen: v6e
topology: v6e:2x2x1
jax: 0.10.0
libtpu: 0.0.40
codegen_flags: <defaults>
</compile_context>

<pallas_src>
import functools

import jax
import jax.numpy as jnp
from jax.experimental import pallas as pl
from jax.experimental.pallas import tpu as pltpu

# ----------------------------- hyperparameters -----------------------------
VAT_TYPE = (0, 1)        # head 0: regression (Gaussian), head 1: classification (KL)
WEIGHT   = (0.5, 1.0)    # per-task weights
VAR      = 0.1           # assumed variance of the predicted Gaussian


# ----------------------------- fused Pallas kernel --------------------------

def _fused_mt_loss_kernel(xx_ref, ww_ref, bb_ref, o_ref, *, R, C, var, weight, vat_type):
    """Single kernel: one MXU matmul for all 4 head evaluations + weighted loss reduction."""
    # One MXU push: [2B, F_in] @ [F_in, 2*(R+C)]  (all blocks resident in VMEM).
    out = (
        jnp.dot(xx_ref[...], ww_ref[...], preferred_element_type=jnp.float32)
        + bb_ref[...]
    )

    B = xx_ref.shape[0] // 2
    off = R + C

    # Student rows (0:B, clean x) use the student weight columns [0 : R+C];
    # teacher rows (B:2B, x_noise) use the teacher (EMA) weight columns [R+C : 2*(R+C)].
    pred_hat_reg = out[:B, 0:R]                   # student regression head
    pred_hat_cls = out[:B, R:off]                 # student classification head
    pred_reg     = out[B:, off:off + R]           # teacher regression head
    pred_cls     = out[B:, off + R:off + R + C]   # teacher classification head

    total = jnp.float32(0.0)

    # ---- task 0 (vat_type == 0): kldiv_gaussian = mean((mu1 - mu2)^2) / (2 * var) ----
    if vat_type[0] is not None:
        diff = pred_hat_reg - pred_reg
        gauss = jnp.sum(diff * diff) / (2.0 * var * (B * R))
        total = total + weight[0] * gauss

    # ---- task 1: F.kl_div(log_softmax(pred_hat), softmax(pred), reduction='batchmean') ----
    if vat_type[1] is not None:
        p = pred_hat_cls
        t = pred_cls

        p_sh = p - jnp.max(p, axis=1, keepdims=True)
        logp_hat = p_sh - jnp.log(jnp.sum(jnp.exp(p_sh), axis=1, keepdims=True))

        t_sh = t - jnp.max(t, axis=1, keepdims=True)
        log_prob_tar = t_sh - jnp.log(jnp.sum(jnp.exp(t_sh), axis=1, keepdims=True))
        prob_tar = jnp.exp(log_prob_tar)          # EUP exp; reuses log_prob_tar, no divide

        kl = jnp.sum(prob_tar * (log_prob_tar - logp_hat)) / B
        total = total + weight[1] * kl

    o_ref[0, 0] = total                           # scalar store into SMEM (1,1) output


# ----------------------------- wrapper ---------------------------------------

def mean_teacher_reg_loss(params_student, params_ema, x, x_noise):
    """Pallas implementation of MeanTeacherRegLoss.forward for tuple input (x, x_noise)."""
    if not any(a is not None for a in VAT_TYPE):
        return jnp.float32(0.0)

    R = params_student["w_reg"].shape[1]
    C = params_student["w_cls"].shape[1]

    sg = jax.lax.stop_gradient  # teacher path runs under torch.no_grad() in the original

    # Stack inputs: rows 0:B = student on clean x, rows B:2B = teacher on x_noise.
    xx = jnp.concatenate([x, sg(x_noise)], axis=0)
    # Pack weights/biases column-wise: [student_reg | student_cls | teacher_reg | teacher_cls].
    ww = jnp.concatenate(
        [params_student["w_reg"], params_student["w_cls"],
         sg(params_ema["w_reg"]), sg(params_ema["w_cls"])], axis=1)
    bb = jnp.concatenate(
        [params_student["b_reg"], params_student["b_cls"],
         sg(params_ema["b_reg"]), sg(params_ema["b_cls"])], axis=1)

    kernel = functools.partial(
        _fused_mt_loss_kernel, R=R, C=C, var=VAR, weight=WEIGHT, vat_type=VAT_TYPE)

    loss = pl.pallas_call(
        kernel,
        out_shape=jax.ShapeDtypeStruct((1, 1), jnp.float32),
        in_specs=[pl.BlockSpec(memory_space=pltpu.MemorySpace.VMEM)] * 3,
        out_specs=pl.BlockSpec(memory_space=pltpu.MemorySpace.SMEM),
    )(xx, ww, bb)
    return loss[0, 0]


# ----------------------------- reference (plain JAX) -------------------------

def _reference_loss(params_student, params_ema, x, x_noise):
    def fwd(p, inp):
        return [inp @ p["w_reg"] + p["b_reg"], inp @ p["w_cls"] + p["b_cls"]]

    pred = fwd(params_ema, x_noise)       # teacher (EMA) on noisy input
    pred_hat = fwd(params_student, x)     # student on clean input

    gauss = jnp.mean((pred_hat[0] - pred[0]) ** 2 / (2.0 * VAR))
    logp_hat = jax.nn.log_softmax(pred_hat[1], axis=1)
    log_prob_tar = jax.nn.log_softmax(pred[1], axis=1)
    prob_tar = jnp.exp(log_prob_tar)
    kl = jnp.sum(prob_tar * (log_prob_tar - logp_hat)) / pred[1].shape[0]
    return WEIGHT[0] * gauss + WEIGHT[1] * kl


# ----------------------------- main -------------------------------------------

if __name__ == "__main__":
    B, F_IN, R, C = 8, 32, 8, 16

    key = jax.random.PRNGKey(0)
    k_x, k_n, k_wr, k_br, k_wc, k_bc = jax.random.split(key, 6)

    x = jax.random.normal(k_x, (B, F_IN), dtype=jnp.float32)
    x_noise = x + 0.1 * jax.random.normal(k_n, (B, F_IN), dtype=jnp.float32)

    params = {
        "w_reg": 0.1 * jax.random.normal(k_wr, (F_IN, R), dtype=jnp.float32),
        "b_reg": 0.01 * jax.random.normal(k_br, (1, R), dtype=jnp.float32),
        "w_cls": 0.1 * jax.random.normal(k_wc, (F_IN, C), dtype=jnp.float32),
        "b_cls": 0.01 * jax.random.normal(k_bc, (1, C), dtype=jnp.float32),
    }
    # ema_model = copy.deepcopy(model) at first forward -> identical weights.
    params_ema = jax.tree_util.tree_map(lambda a: a, params)

    loss = jax.block_until_ready(
        mean_teacher_reg_loss(params, params_ema, x, x_noise)
    )
    ref = _reference_loss(params, params_ema, x, x_noise)

    assert jnp.isfinite(loss), "loss is not finite"
    assert jnp.allclose(loss, ref, rtol=1e-4, atol=1e-5), (loss, ref)
    print("KERNEL_OK")
</pallas_src>

<mosaic_0001>
module attributes {stable_mosaic.version = 11 : i64} {
  func.func @_fused_mt_loss_kernel(%arg0: memref<16x32xf32, #tpu.memory_space<vmem>>, %arg1: memref<32x48xf32, #tpu.memory_space<vmem>>, %arg2: memref<1x48xf32, #tpu.memory_space<vmem>>, %arg3: memref<1x1xf32, #tpu.memory_space<smem>>) attributes {dimension_semantics = [], scalar_prefetch = 0 : i64, scratch_operands = 0 : i64, tpu.core_type = #tpu.core_type<tc>} {
    %c0 = arith.constant 0 : index
    %c0_0 = arith.constant 0 : index
    %0 = vector.load %arg0[%c0, %c0_0] : memref<16x32xf32, #tpu.memory_space<vmem>>, vector<16x32xf32>
    %c0_1 = arith.constant 0 : index
    %c0_2 = arith.constant 0 : index
    %1 = vector.load %arg1[%c0_1, %c0_2] : memref<32x48xf32, #tpu.memory_space<vmem>>, vector<32x48xf32>
    %cst = arith.constant dense<0.000000e+00> : vector<16x48xf32>
    %2 = tpu.matmul %0, %1, %cst {dimension_numbers = #tpu.dot_dimension_numbers<[1], [0], [0], [1], [0, 0, 1, 1], [], []>} : vector<16x32xf32>, vector<32x48xf32>, vector<16x48xf32> -> vector<16x48xf32>
    %c0_3 = arith.constant 0 : index
    %c0_4 = arith.constant 0 : index
    %3 = vector.load %arg2[%c0_3, %c0_4] : memref<1x48xf32, #tpu.memory_space<vmem>>, vector<1x48xf32>
    %4 = vector.broadcast %3 : vector<1x48xf32> to vector<16x48xf32>
    %5 = arith.addf %2, %4 : vector<16x48xf32>
    %6 = vector.extract_strided_slice %5 {offsets = [0, 0], sizes = [8, 8], strides = [1, 1]} : vector<16x48xf32> to vector<8x8xf32>
    %7 = vector.extract_strided_slice %5 {offsets = [0, 8], sizes = [8, 16], strides = [1, 1]} : vector<16x48xf32> to vector<8x16xf32>
    %8 = vector.extract_strided_slice %5 {offsets = [8, 24], sizes = [8, 8], strides = [1, 1]} : vector<16x48xf32> to vector<8x8xf32>
    %9 = vector.extract_strided_slice %5 {offsets = [8, 32], sizes = [8, 16], strides = [1, 1]} : vector<16x48xf32> to vector<8x16xf32>
    %10 = arith.subf %6, %8 : vector<8x8xf32>
    %11 = arith.mulf %10, %10 : vector<8x8xf32>
    %12 = vector.shape_cast %11 : vector<8x8xf32> to vector<1x8x8xf32>
    %cst_5 = arith.constant dense<0.000000e+00> : vector<1xf32>
    %13 = vector.multi_reduction <add>, %12, %cst_5 [1, 2] : vector<1x8x8xf32> to vector<1xf32>
    %14 = vector.shape_cast %13 : vector<1xf32> to vector<1x1x1xf32>
    %15 = vector.extract %14[0, 0, 0] : f32 from vector<1x1x1xf32>
    %cst_6 = arith.constant 1.280000e+01 : f32
    %16 = arith.divf %15, %cst_6 : f32
    %cst_7 = arith.constant 5.000000e-01 : f32
    %17 = arith.mulf %cst_7, %16 : f32
    %cst_8 = arith.constant 0.000000e+00 : f32
    %18 = arith.addf %cst_8, %17 : f32
    %cst_9 = arith.constant dense<0xFF800000> : vector<8xf32>
    %19 = vector.multi_reduction <maximumf>, %7, %cst_9 [1] : vector<8x16xf32> to vector<8xf32>
    %20 = vector.shape_cast %19 : vector<8xf32> to vector<8x1xf32>
    %21 = vector.broadcast %20 : vector<8x1xf32> to vector<8x16xf32>
    %22 = arith.subf %7, %21 : vector<8x16xf32>
    %23 = math.exp %22 : vector<8x16xf32>
    %cst_10 = arith.constant dense<0.000000e+00> : vector<8xf32>
    %24 = vector.multi_reduction <add>, %23, %cst_10 [1] : vector<8x16xf32> to vector<8xf32>
    %25 = vector.shape_cast %24 : vector<8xf32> to vector<8x1xf32>
    %26 = math.log %25 : vector<8x1xf32>
    %27 = vector.broadcast %26 : vector<8x1xf32> to vector<8x16xf32>
    %28 = arith.subf %22, %27 : vector<8x16xf32>
    %cst_11 = arith.constant dense<0xFF800000> : vector<8xf32>
    %29 = vector.multi_reduction <maximumf>, %9, %cst_11 [1] : vector<8x16xf32> to vector<8xf32>
    %30 = vector.shape_cast %29 : vector<8xf32> to vector<8x1xf32>
    %31 = vector.broadcast %30 : vector<8x1xf32> to vector<8x16xf32>
    %32 = arith.subf %9, %31 : vector<8x16xf32>
    %33 = math.exp %32 : vector<8x16xf32>
    %cst_12 = arith.constant dense<0.000000e+00> : vector<8xf32>
    %34 = vector.multi_reduction <add>, %33, %cst_12 [1] : vector<8x16xf32> to vector<8xf32>
    %35 = vector.shape_cast %34 : vector<8xf32> to vector<8x1xf32>
    %36 = math.log %35 : vector<8x1xf32>
    %37 = vector.broadcast %36 : vector<8x1xf32> to vector<8x16xf32>
    %38 = arith.subf %32, %37 : vector<8x16xf32>
    %39 = math.exp %38 : vector<8x16xf32>
    %40 = arith.subf %38, %28 : vector<8x16xf32>
    %41 = arith.mulf %39, %40 : vector<8x16xf32>
    %42 = vector.shape_cast %41 : vector<8x16xf32> to vector<1x8x16xf32>
    %cst_13 = arith.constant dense<0.000000e+00> : vector<1xf32>
    %43 = vector.multi_reduction <add>, %42, %cst_13 [1, 2] : vector<1x8x16xf32> to vector<1xf32>
    %44 = vector.shape_cast %43 : vector<1xf32> to vector<1x1x1xf32>
    %45 = vector.extract %44[0, 0, 0] : f32 from vector<1x1x1xf32>
    %cst_14 = arith.constant 8.000000e+00 : f32
    %46 = arith.divf %45, %cst_14 : f32
    %cst_15 = arith.constant 1.000000e+00 : f32
    %47 = arith.mulf %cst_15, %46 : f32
    %48 = arith.addf %18, %47 : f32
    %c0_16 = arith.constant 0 : index
    %c0_17 = arith.constant 0 : index
    %49 = memref.load %arg3[%c0_16, %c0_17] : memref<1x1xf32, #tpu.memory_space<smem>>
    memref.store %48, %arg3[%c0_16, %c0_17] : memref<1x1xf32, #tpu.memory_space<smem>>
    return
  }
}

</mosaic_0001>

<bundles_post_ra>
// kernel: tpu_custom_call.1
= control target key start
LH: loop header
LB: loop body
LE: loop exit
PB: predicated region body
PF: predicated region fallthrough
CT: control target
= control target key end

     0   :  { %8 = vsyncpa [#allocation3], 0  ;;  %s381_s0 = inlined_call_operand.hbm [shape: f32[16,32], index: 0, kind: input, shape index: {}]   ;;  %s382_s1 = inlined_call_operand.hbm [shape: f32[32,48], index: 1, kind: input, shape index: {}]   ;;  %s383_s2 = inlined_call_operand.vmem [shape: f32[1,48], index: 2, kind: input, shape index: {}]   ;;  %s384_s3 = inlined_call_operand.hbm [shape: f32[1,1], index: 3, kind: output, shape index: {}]  }
   0x1   :  { %9 = vsyncpa [#allocation6], 0 }
   0x2   :  { %10 = vsyncpa [#allocation4], 0  ;;  %s335_s12 = smov [#allocation2]  }
   0x3   :  { %s16_s13 = sshll.u32 %s335_s12, 4  ;;  %s17_s13 = int_to_ptr.vmem [resolvable:$true] %s16_s13 }
   0x4   :  { %s289_s14 = scalar_lea.vmem %s17_s13, 256  ;;  %p294_p1 = scmp.lt.s32.totalorder %s17_s13, %s17_s13 }
   0x5   :  { %p290_p0 = scmp.ne.s32.totalorder %s17_s13, %s289_s14  ;;  %p295_p2 = scmp.lt.s32.totalorder %s289_s14, %s289_s14 }
   0x7   :  { %p296_p3 = por %p295_p2, %p294_p1 }
   0x9   :  { %p297_p4 = pnand %p296_p3, %p290_p0 }
   0xb   :  { %300 = shalt.err (!%p297_p4)
}
   0xc   :  { %s336_s15 = smov 128   ;;  %s337_s16 = smov 8  }
   0xd   :  { %22 = dma.hbm_to_vmem [thread:$0]  %s381_s0, 256, %s17_s13, [#allocation3], %s336_s15, %s336_s15, %s337_s16  }
   0xe   :  { %s338_s19 = smov [#allocation5]  }
   0xf   :  { %s28_s20 = sshll.u32 %s338_s19, 4  ;;  %s29_s20 = int_to_ptr.vmem [resolvable:$true] %s28_s20 }
  0x10   :  { %s309_s21 = scalar_lea.vmem %s29_s20, 512  ;;  %p314_p6 = scmp.lt.s32.totalorder %s29_s20, %s29_s20 }
  0x11   :  { %p310_p5 = scmp.ne.s32.totalorder %s29_s20, %s309_s21  ;;  %p315_p7 = scmp.lt.s32.totalorder %s309_s21, %s309_s21 }
  0x13   :  { %p316_p8 = por %p315_p7, %p314_p6 }
  0x15   :  { %p317_p9 = pnand %p316_p8, %p310_p5 }
  0x17   :  { %320 = shalt.err (!%p317_p9)
}
  0x18   :  { %34 = dma.hbm_to_vmem [thread:$0]  %s382_s1, 512, %s29_s20, [#allocation6], %s336_s15, %s336_s15, %s337_s16  }
  0x19   :  { %329 = dma.done.wait [#allocation3], 256  }
  0x1a   :  { %330 = vsyncadd [#allocation3], 4294967040 }
  0x1b   :  { %331 = dma.done.wait [#allocation6], 512  }
  0x1c   :  { %332 = vsyncadd [#allocation6], 4294966784  ;;  %vm56_vm0 = vcmask 261120   ;;  %v48_v0 = vld [vmem:[#allocation5 + $0x18] sm:$0xff]  ;;  %v47_v1 = vld [vmem:[#allocation5 + $0x10] sm:$0xff]  ;;  %vm160_vm1 = vcmask 195648  }
  0x1d   :  { %247 = vmatprep.subr.mxu0 %v48_v0  ;;  %v43_v2 = vld [vmem:[#allocation2] sm:$0xff]  ;;  %v46_v3 = vld [vmem:[#allocation5 + $0x8] sm:$0xff]  ;;  %v45_v4 = vld [vmem:[#allocation5] sm:$0xff]  ;;  %vm178_vm2 = vcmask 392448   ;;  %s339_s24 = smov 120   ;;  %vm171_vm3 = vcmask 130048  }
  0x1e   :  { %248 = vmatpush3.msra.mxu0 %v48_v0  ;;  %255 = vmatprep.mubr.msk.f32.mxu0 %vm56_vm0, %v43_v2  ;;  %v44_v5 = vld [vmem:[#allocation2 + $0x8] sm:$0xff]  ;;  %v238_v7 = vld [vmem:[%s383_s2] ss:$0 sm:$0xff]  ;;  %s340_s2 = smov 96   ;;  %s341_s25 = smov 24   ;;  %vm144_vm4 = vcmask 64512  }
  0x1f   :  { %249 = vmatprep.subr.mxu0 %v47_v1  ;;  %s342_s26 = smov 104   ;;  %s343_s6 = smov [#allocation7]  }
  0x20   :  { %250 = vmatpush3.msra.mxu0 %v47_v1 }
  0x21   :  { %251 = vmatprep.subr.mxu0 %v46_v3 }
  0x22   :  { %252 = vmatpush3.msra.mxu0 %v46_v3 }
  0x23   :  { %253 = vmatprep.subr.mxu0 %v45_v4 }
  0x24   :  { %254 = vmatpush3.msra.mxu0 %v45_v4 }
  0x25   :  { %256 = vmatmul.mubr.msk.f32.vlgmr.msra.gmra.mxu0 %vm56_vm0, %v44_v5 }
  0xe5   :  { %v257_v6 = vpop.f32.mrf.mxu0 }
  0xe6   :  { %v135_v10 = vadd.f32 %v257_v6, %v238_v7 }
  0xe7   :  { %v129_v8 = vpop.f32.mrf.mxu0 }
  0xe8   :  { %v130_v9 = vadd.f32 %v238_v7, %v129_v8  ;;  %v179_v12 = vsel %vm178_vm2, %v135_v10, -inf }
  0xea   :  { %v161_v11 = vsel %vm160_vm1, %v130_v9, -inf }
  0xeb   :  { %162 = vmax.xlane.f32.xlu0 %v161_v11 }
  0xef   :  { %180 = vmax.xlane.f32.xlu0 %v179_v12 }
 0x174   :  { %v163_v13 = vpop.xlane.xlu0 %162 }
 0x175   :  { %v164_v14 = vsub.f32 %v130_v9, %v163_v13 }
 0x177   :  { %v165_v15 = vmul.f32 1.442695, %v164_v14 }
 0x178   :  { %v181_v16 = vpop.xlane.xlu0 %180 }
 0x179   :  { %271 = vpow2.f32 %v165_v15  ;;  %v182_v17 = vsub.f32 %v135_v10, %v181_v16 }
 0x17b   :  { %v183_v18 = vmul.f32 1.442695, %v182_v17 }
 0x17d   :  { %273 = vpow2.f32 %v183_v18 }
 0x186   :  { %v272_v19 = vpop.eup %271 }
 0x187   :  { %168 = vrot.lane.b32.xlu1 %v272_v19, %s339_s24 }
 0x18a   :  { %v274_v20 = vpop.eup %273 }
 0x18b   :  { %186 = vrot.lane.b32.xlu1 %v274_v20, %s340_s2 }
 0x1f9   :  { %v169_v21 = vpop.permute.xlu1 %168 }
 0x1fa   :  { %v172_v22 = vsel %vm171_vm3, %v169_v21, 0.0 }
 0x1fb   :  { %173 = vadd.xlane.f32.xlu0 %v172_v22 }
 0x1fd   :  { %v187_v23 = vpop.permute.xlu1 %186 }
 0x1fe   :  { %v189_v24 = vsel %vm171_vm3, %v187_v23, 0.0 }
 0x1ff   :  { %190 = vadd.xlane.f32.xlu1 %v189_v24 }
 0x284   :  { %v174_v25 = vpop.xlane.xlu0 %173 }
 0x285   :  { %275 = vlog2.f32 %v174_v25 }
 0x288   :  { %v191_v29 = vpop.xlane.xlu1 %190 }
 0x289   :  { %277 = vlog2.f32 %v191_v29 }
 0x292   :  { %v276_v26 = vpop.eup %275 }
 0x293   :  { %v176_v27 = vmul.f32 0.6931472, %v276_v26 }
 0x295   :  { %v177_v28 = vsub.f32 %v164_v14, %v176_v27 }
 0x296   :  { %v278_v30 = vpop.eup %277 }
 0x297   :  { %198 = vrot.lane.b32.xlu0 %v177_v28, %s341_s25  ;;  %v193_v31 = vmul.f32 0.6931472, %v278_v30 }
 0x299   :  { %v194_v32 = vsub.f32 %v182_v17, %v193_v31 }
 0x29b   :  { %139 = vrot.lane.b32.xlu0 %v135_v10, %s342_s26  ;;  %v195_v33 = vmul.f32 1.442695, %v194_v32 }
 0x29d   :  { %279 = vpow2.f32 %v195_v33 }
 0x2aa   :  { %v280_v36 = vpop.eup %279 }
 0x309   :  { %v199_v34 = vpop.permute.xlu0 %198 }
 0x30a   :  { %v201_v35 = vsub.f32 %v194_v32, %v199_v34 }
 0x30c   :  { %v202_v37 = vmul.f32 %v280_v36, %v201_v35 }
 0x30d   :  { %v140_v38 = vpop.permute.xlu0 %139 }
 0x30e   :  { %204 = vrot.lane.b32.xlu0 %v202_v37, %s340_s2  ;;  %v142_v39 = vsub.f32 %v130_v9, %v140_v38 }
 0x310   :  { %v143_v40 = vmul.f32 %v142_v39, %v142_v39 }
 0x312   :  { %v145_v41 = vsel %vm144_vm4, %v143_v40, 0.0 }
 0x32d   :  { %146 = vadd.xlane.f32.xlu0 %v145_v41 }
 0x380   :  { %v205_v42 = vpop.permute.xlu0 %204 }
 0x381   :  { %v207_v43 = vsel %vm171_vm3, %v205_v42, 0.0 }
 0x382   :  { %208 = vadd.xlane.f32.xlu1 %v207_v43 }
 0x3b6   :  { %v147_v44 = vpop.xlane.xlu0 %146 }
 0x3b7   :  { %v148_v45 = vrot.slane %v147_v44, 4 }
 0x3b9   :  { %v149_v46 = vadd.f32 %v148_v45, %v147_v44 }
 0x3bb   :  { %v150_v47 = vrot.slane %v149_v46, 2 }
 0x3bd   :  { %v151_v48 = vadd.f32 %v150_v47, %v149_v46 }
 0x3bf   :  { %v152_v49 = vrot.slane %v151_v48, 1 }
 0x3c1   :  { %v153_v50 = vadd.f32 %v152_v49, %v151_v48 }
 0x3c3   :  { %258 = vpush %v153_v50 }
 0x3f4   :  { %s259_s27 = spop %258 }
 0x3f5   :  { %s157_s28 = smul.f32 0.078125, %s259_s27 }
 0x3f7   :  { %s158_s29 = smul.f32 0.5, %s157_s28 }
 0x40b   :  { %v209_v51 = vpop.xlane.xlu1 %208 }
 0x40c   :  { %v210_v52 = vrot.slane %v209_v51, 4 }
 0x40e   :  { %v211_v53 = vadd.f32 %v210_v52, %v209_v51 }
 0x410   :  { %v212_v54 = vrot.slane %v211_v53, 2 }
 0x412   :  { %v213_v55 = vadd.f32 %v212_v54, %v211_v53 }
 0x414   :  { %v214_v56 = vrot.slane %v213_v55, 1 }
 0x416   :  { %v215_v57 = vadd.f32 %v214_v56, %v213_v55 }
 0x418   :  { %260 = vpush %v215_v57 }
 0x449   :  { %s261_s30 = spop %260 }
 0x44a   :  { %s219_s4 = smul.f32 0.125, %s261_s30 }
 0x44c   :  { %s220_s5 = sadd.f32 %s219_s4, %s158_s29 }
 0x44e   :  { %222 = sst [smem:[#allocation7]] %s220_s5 }
 0x44f   :  { %230 = dma.smem_to_hbm %s343_s6, 16, %s384_s3, [#allocation4]  }
 0x450   :  { %333 = dma.done.wait [#allocation4], 16  }
 0x451   :  { %334 = vsyncadd [#allocation4], 4294967280 }
 0x452   :  { %234 = sfence }
 0x453   :  { %235 = vsyncpa [#allocation3], 1 }
 0x454   :  { %236 = vsyncpa [#allocation6], 1 }
 0x455   :  { %237 = vsyncpa [#allocation4], 1 }

</bundles_post_ra>
